<compile_context>
chip_gen: v5e
topology: v5e:2x2
jax: 0.10.0
libtpu: 0.0.40
codegen_flags: <defaults>
</compile_context>

<pallas_src>
import functools

import jax
import jax.numpy as jnp
from jax.experimental import pallas as pl
from jax.experimental.pallas import tpu as pltpu


def _head_kernel(use_cls_token, hs_ref, w1_ref, b1_ref, w2_ref, b2_ref, out_ref):
    if use_cls_token:
        x = hs_ref[...].astype(jnp.float32)                    # (TB, D) CLS rows
    else:
        x = jnp.mean(hs_ref[...].astype(jnp.float32), axis=1)  # (TB, S, D) -> (TB, D)

    # Linear(D, 512) + ReLU
    h = jnp.dot(x, w1_ref[...], preferred_element_type=jnp.float32)
    h = jnp.maximum(h + b1_ref[...], 0.0)          # b1 is (1, H), broadcasts

    # Dropout -> identity in eval mode.

    # Linear(512, Tp)   (Tp = num_targets zero-padded to a multiple of 128)
    logits = jnp.dot(h, w2_ref[...], preferred_element_type=jnp.float32)
    out_ref[...] = (logits + b2_ref[...]).astype(out_ref.dtype)


def _round_up(x, m):
    return (x + m - 1) // m * m


def _vmem_budgets():
    """(tile_budget_bytes, vmem_limit_bytes) derived from this chip's VMEM."""
    vmem_cap = 64 << 20                              # conservative fallback (v7x per-TC)
    try:
        vmem_cap = int(getattr(pltpu.get_tpu_info(), "vmem_capacity_bytes", vmem_cap))
    except Exception:
        pass
    vmem_limit = min(100 << 20, vmem_cap - (8 << 20))  # v5e/v6e: 100 MiB, v7x: 56 MiB
    budget = max(vmem_limit - (16 << 20), 8 << 20)     # headroom: temporaries + scratch
    return budget, vmem_limit


def _pick_batch_tile(B, S_eff, D, H, Tp, hs_itemsize, budget_bytes):
    """Batch tile keeping double-buffered blocks within the VMEM budget."""
    bytes_per_row = S_eff * D * hs_itemsize * 2   # input block, double-buffered
    bytes_per_row += Tp * 4 * 2                   # output block, double-buffered
    bytes_per_row += (D + H + Tp) * 4             # x / hidden / logits temporaries
    weight_bytes = (D * H + H + H * Tp + Tp) * 4 * 2   # weights allocated x2 today
    avail = max(budget_bytes - weight_bytes, bytes_per_row * 8)
    tb = (avail // bytes_per_row) // 8 * 8
    tb = int(max(8, min(8192, tb)))
    tb = min(tb, _round_up(B, 8))
    # Give the "parallel" batch axis >= 2 grid steps when possible so both
    # v7x TensorCores get work (negligible cost on single-TC v5e/v6e).
    while tb > 8 and pl.cdiv(B, tb) < 2:
        tb = max(8, ((tb // 2) + 7) // 8 * 8)
    if pl.cdiv(B, tb) == 1:
        tb = B   # single block: make it exactly full so every BlockSpec dim is exact
    return tb


def patchtst_classification_head(hidden_states, w1, b1, w2, b2, *, use_cls_token=False):
    """hidden_states: (B, S, D); w1: (D, 512); b1: (512,); w2: (512, T); b2: (T,)."""
    B, S, D = hidden_states.shape
    H = w1.shape[1]
    T = w2.shape[1]

    # Weights/biases are tiny and stay VMEM-resident: keep them f32.
    w1 = w1.astype(jnp.float32)
    w2 = w2.astype(jnp.float32)

    # Lane-dense output: pad num_targets up to a multiple of 128 (min 128).
    Tp = _round_up(max(T, 128), 128)
    if Tp != T:
        w2 = jnp.pad(w2, ((0, 0), (0, Tp - T)))
        b2 = jnp.pad(b2.astype(jnp.float32), ((0, Tp - T),))
    b1_2d = b1.reshape(1, H).astype(jnp.float32)
    b2_2d = b2.reshape(1, Tp).astype(jnp.float32)

    # Input selection (native dtype, no wrapper astype).  CLS path only moves
    # the seq-0 rows (B*D elements) via a cheap XLA slice.
    if use_cls_token:
        hs_in = hidden_states[:, 0, :]                 # (B, D)
        S_eff = 1
    else:
        hs_in = hidden_states                          # (B, S, D)
        S_eff = S

    hs_itemsize = jnp.dtype(hs_in.dtype).itemsize
    budget, vmem_limit = _vmem_budgets()
    TB = _pick_batch_tile(B, S_eff, D, H, Tp, hs_itemsize, budget)
    grid = (pl.cdiv(B, TB),)      # no batch padding: Pallas masks edge blocks

    if use_cls_token:
        hs_spec = pl.BlockSpec((TB, D), lambda i: (i, 0))
    else:
        hs_spec = pl.BlockSpec((TB, S, D), lambda i: (i, 0, 0))

    kernel = functools.partial(_head_kernel, use_cls_token)

    weight_bytes = (D * H + H + H * Tp + Tp) * 4
    cost = pl.CostEstimate(
        flops=2 * B * (D * H + H * Tp),
        transcendentals=0,
        bytes_accessed=B * S_eff * D * hs_itemsize + weight_bytes + B * Tp * 4,
    )

    out = pl.pallas_call(
        kernel,
        out_shape=jax.ShapeDtypeStruct((B, Tp), jnp.float32),
        grid_spec=pltpu.PrefetchScalarGridSpec(
            num_scalar_prefetch=0,
            grid=grid,
            in_specs=[
                hs_spec,
                pl.BlockSpec((D, H), lambda i: (0, 0)),    # weights stay resident
                pl.BlockSpec((1, H), lambda i: (0, 0)),
                pl.BlockSpec((H, Tp), lambda i: (0, 0)),
                pl.BlockSpec((1, Tp), lambda i: (0, 0)),
            ],
            out_specs=pl.BlockSpec((TB, Tp), lambda i: (i, 0)),
        ),
        compiler_params=pltpu.CompilerParams(
            dimension_semantics=("parallel",),             # 2 TCs on v7x
            vmem_limit_bytes=int(vmem_limit),
        ),
        cost_estimate=cost,
    )(hs_in, w1, b1_2d, w2, b2_2d)

    return out[:, :T]


def _reference(hidden_states, w1, b1, w2, b2, *, use_cls_token=False):
    x = hidden_states[:, 0] if use_cls_token else hidden_states.mean(axis=1)
    h = jnp.maximum(x @ w1 + b1, 0.0)
    return h @ w2 + b2


if __name__ == "__main__":
    # Small config consistent with the module:
    #   batch=2, num_patches(seq)=8, d_model=32, classifier hidden=512
    #   (hardcoded in the module), num_targets=6.
    B, S, D, H, T = 2, 8, 32, 512, 6

    key = jax.random.PRNGKey(0)
    k_hs, k_w1, k_b1, k_w2, k_b2 = jax.random.split(key, 5)

    hidden_states = jax.random.normal(k_hs, (B, S, D), dtype=jnp.float32)
    w1 = jax.random.normal(k_w1, (D, H), dtype=jnp.float32) * 0.05
    b1 = jax.random.normal(k_b1, (H,), dtype=jnp.float32) * 0.05
    w2 = jax.random.normal(k_w2, (H, T), dtype=jnp.float32) * 0.05
    b2 = jax.random.normal(k_b2, (T,), dtype=jnp.float32) * 0.05

    for use_cls in (False, True):
        out = patchtst_classification_head(
            hidden_states, w1, b1, w2, b2, use_cls_token=use_cls)
        out = jax.block_until_ready(out)
        ref = _reference(hidden_states, w1, b1, w2, b2, use_cls_token=use_cls)
        assert out.shape == (B, T)
        assert jnp.allclose(out, ref, atol=1e-4, rtol=1e-4), (
            f"mismatch vs reference (use_cls_token={use_cls})")

    print("KERNEL_OK")
</pallas_src>

<mosaic_0001>
module attributes {stable_mosaic.version = 11 : i64} {
  func.func @_head_kernel(%arg0: i32, %arg1: memref<2x8x32xf32, #tpu.memory_space<vmem>>, %arg2: memref<32x512xf32, #tpu.memory_space<vmem>>, %arg3: memref<1x512xf32, #tpu.memory_space<vmem>>, %arg4: memref<512x128xf32, #tpu.memory_space<vmem>>, %arg5: memref<1x128xf32, #tpu.memory_space<vmem>>, %arg6: memref<2x128xf32, #tpu.memory_space<vmem>>) attributes {dimension_semantics = [#tpu.dimension_semantics<parallel>], iteration_bounds = array<i64: 1>, scalar_prefetch = 0 : i64, scratch_operands = 0 : i64, tpu.core_type = #tpu.core_type<tc>, window_params = [{transform_indices = @transform_0, window_bounds = array<i64: 2, 8, 32>}, {pipeline_mode = #tpu.pipeline_mode<synchronous>, transform_indices = @transform_1, window_bounds = array<i64: 32, 512>}, {pipeline_mode = #tpu.pipeline_mode<synchronous>, transform_indices = @transform_2, window_bounds = array<i64: 1, 512>}, {pipeline_mode = #tpu.pipeline_mode<synchronous>, transform_indices = @transform_3, window_bounds = array<i64: 512, 128>}, {pipeline_mode = #tpu.pipeline_mode<synchronous>, transform_indices = @transform_4, window_bounds = array<i64: 1, 128>}, {transform_indices = @transform_5, window_bounds = array<i64: 2, 128>}]} {
    %c0 = arith.constant 0 : index
    %c0_0 = arith.constant 0 : index
    %c0_1 = arith.constant 0 : index
    %0 = vector.load %arg1[%c0, %c0_0, %c0_1] : memref<2x8x32xf32, #tpu.memory_space<vmem>>, vector<2x8x32xf32>
    %cst = arith.constant dense<0.000000e+00> : vector<2x32xf32>
    %1 = vector.multi_reduction <add>, %0, %cst [1] : vector<2x8x32xf32> to vector<2x32xf32>
    %cst_2 = arith.constant 8.000000e+00 : f32
    %2 = vector.broadcast %cst_2 : f32 to vector<2x32xf32>
    %3 = arith.divf %1, %2 : vector<2x32xf32>
    %c0_3 = arith.constant 0 : index
    %c0_4 = arith.constant 0 : index
    %4 = vector.load %arg2[%c0_3, %c0_4] : memref<32x512xf32, #tpu.memory_space<vmem>>, vector<32x512xf32>
    %cst_5 = arith.constant dense<0.000000e+00> : vector<2x512xf32>
    %5 = tpu.matmul %3, %4, %cst_5 {dimension_numbers = #tpu.dot_dimension_numbers<[1], [0], [0], [1], [0, 0, 1, 1], [], []>} : vector<2x32xf32>, vector<32x512xf32>, vector<2x512xf32> -> vector<2x512xf32>
    %c0_6 = arith.constant 0 : index
    %c0_7 = arith.constant 0 : index
    %6 = vector.load %arg3[%c0_6, %c0_7] : memref<1x512xf32, #tpu.memory_space<vmem>>, vector<1x512xf32>
    %7 = vector.broadcast %6 : vector<1x512xf32> to vector<2x512xf32>
    %8 = arith.addf %5, %7 : vector<2x512xf32>
    %cst_8 = arith.constant 0.000000e+00 : f32
    %9 = vector.broadcast %cst_8 : f32 to vector<2x512xf32>
    %10 = arith.maximumf %8, %9 : vector<2x512xf32>
    %c0_9 = arith.constant 0 : index
    %c0_10 = arith.constant 0 : index
    %11 = vector.load %arg4[%c0_9, %c0_10] : memref<512x128xf32, #tpu.memory_space<vmem>>, vector<512x128xf32>
    %cst_11 = arith.constant dense<0.000000e+00> : vector<2x128xf32>
    %12 = tpu.matmul %10, %11, %cst_11 {dimension_numbers = #tpu.dot_dimension_numbers<[1], [0], [0], [1], [0, 0, 1, 1], [], []>} : vector<2x512xf32>, vector<512x128xf32>, vector<2x128xf32> -> vector<2x128xf32>
    %c0_12 = arith.constant 0 : index
    %c0_13 = arith.constant 0 : index
    %13 = vector.load %arg5[%c0_12, %c0_13] : memref<1x128xf32, #tpu.memory_space<vmem>>, vector<1x128xf32>
    %14 = vector.broadcast %13 : vector<1x128xf32> to vector<2x128xf32>
    %15 = arith.addf %12, %14 : vector<2x128xf32>
    %c0_14 = arith.constant 0 : index
    %c0_15 = arith.constant 0 : index
    %16 = vector.load %arg6[%c0_14, %c0_15] : memref<2x128xf32, #tpu.memory_space<vmem>>, vector<2x128xf32>
    tpu.vector_store %arg6[%c0_14, %c0_15], %15 {strides = array<i32>} : memref<2x128xf32, #tpu.memory_space<vmem>>, vector<2x128xf32>,
    return
  }
  func.func @transform_0(%arg0: i32) -> (i32, i32, i32) {
    %c0_i32 = arith.constant 0 : i32
    %c0_i32_0 = arith.constant 0 : i32
    %c0_i32_1 = arith.constant 0 : i32
    return %arg0, %c0_i32, %c0_i32_0 : i32, i32, i32
  }
  func.func @transform_1(%arg0: i32) -> (i32, i32) {
    %c0_i32 = arith.constant 0 : i32
    %c0_i32_0 = arith.constant 0 : i32
    %c0_i32_1 = arith.constant 0 : i32
    return %c0_i32, %c0_i32_0 : i32, i32
  }
  func.func @transform_2(%arg0: i32) -> (i32, i32) {
    %c0_i32 = arith.constant 0 : i32
    %c0_i32_0 = arith.constant 0 : i32
    %c0_i32_1 = arith.constant 0 : i32
    return %c0_i32, %c0_i32_0 : i32, i32
  }
  func.func @transform_3(%arg0: i32) -> (i32, i32) {
    %c0_i32 = arith.constant 0 : i32
    %c0_i32_0 = arith.constant 0 : i32
    %c0_i32_1 = arith.constant 0 : i32
    return %c0_i32, %c0_i32_0 : i32, i32
  }
  func.func @transform_4(%arg0: i32) -> (i32, i32) {
    %c0_i32 = arith.constant 0 : i32
    %c0_i32_0 = arith.constant 0 : i32
    %c0_i32_1 = arith.constant 0 : i32
    return %c0_i32, %c0_i32_0 : i32, i32
  }
  func.func @transform_5(%arg0: i32) -> (i32, i32) {
    %c0_i32 = arith.constant 0 : i32
    %c0_i32_0 = arith.constant 0 : i32
    return %arg0, %c0_i32 : i32, i32
  }
}

</mosaic_0001>

<bundles_post_ra>
// kernel: tpu_custom_call.1
= control target key start
LH: loop header
LB: loop body
LE: loop exit
PB: predicated region body
PF: predicated region fallthrough
CT: control target
= control target key end

     0   :  { %10 = vsyncpa [#allocation3], 0  ;;  %s608_s0 = inlined_call_operand.hbm [shape: f32[2,8,32], index: 0, kind: input, shape index: {}]   ;;  %s609_s1 = inlined_call_operand.hbm [shape: f32[32,512], index: 1, kind: input, shape index: {}]   ;;  %s610_s2 = inlined_call_operand.hbm [shape: f32[1,512], index: 2, kind: input, shape index: {}]   ;;  %s611_s3 = inlined_call_operand.hbm [shape: f32[512,128], index: 3, kind: input, shape index: {}]   ;;  %s612_s4 = inlined_call_operand.vmem [shape: f32[1,128], index: 4, kind: input, shape index: {}]   ;;  %s613_s5 = inlined_call_operand.hbm [shape: f32[2,128], index: 5, kind: output, shape index: {}]  }
   0x1   :  { %11 = vsyncpa [#allocation6], 0 }
   0x2   :  { %12 = vsyncpa [#allocation9], 0  ;;  %s31_s20 = sshll.u32 %s609_s1, 4  ;;  %s32_s20 = int_to_ptr.hbm [resolvable:$true] %s31_s20 }
   0x3   :  { %13 = vsyncpa [#allocation4], 0  ;;  %s537_s21 = smov [#allocation5]   ;;  %s18_s25 = sshll.u32 %s608_s0, 4  ;;  %s19_s25 = int_to_ptr.hbm [resolvable:$true] %s18_s25 }
   0x4   :  { %s33_s22 = sshll.u32 %s537_s21, 4  ;;  %s538_s26 = smov 512   ;;  %s34_s22 = int_to_ptr.vmem [resolvable:$true] %s33_s22 }
   0x5   :  { %s539_s27 = smov 32   ;;  %s540_s28 = smov [#allocation2]  }
   0x6   :  { %39 = dma.hbm_to_vmem [thread:$0]  %s32_s20, 2048, %s34_s22, [#allocation6], %s538_s26, %s538_s26, %s539_s27  }
   0x7   :  { %s20_s29 = sshll.u32 %s540_s28, 4  ;;  %s541_s30 = smov 128   ;;  %s21_s29 = int_to_ptr.vmem [resolvable:$true] %s20_s29 }
   0x8   :  { %s542_s6 = smov 8   ;;  %s45_s8 = sshll.u32 %s610_s2, 4  ;;  %s46_s8 = int_to_ptr.hbm [resolvable:$true] %s45_s8 }
   0x9   :  { %26 = dma.hbm_to_vmem [thread:$0]  %s19_s25, 256, %s21_s29, [#allocation3], %s541_s30, %s541_s30, %s542_s6  }
   0xa   :  { %s543_s9 = smov [#allocation7]   ;;  %s55_s12 = sshll.u32 %s611_s3, 4  ;;  %s56_s12 = int_to_ptr.hbm [resolvable:$true] %s55_s12 }
   0xb   :  { %s47_s10 = sshll.u32 %s543_s9, 4  ;;  %s544_s13 = smov [#allocation8]   ;;  %s48_s10 = int_to_ptr.vmem [resolvable:$true] %s47_s10 }
   0xc   :  { %50 = dma.hbm_to_vmem [thread:$0]  %s46_s8, 64, %s48_s10, [#allocation6]  }
   0xd   :  { %s57_s14 = sshll.u32 %s544_s13, 4  ;;  %s58_s14 = int_to_ptr.vmem [resolvable:$true] %s57_s14 }
   0xe   :  { %63 = dma.hbm_to_vmem [thread:$0]  %s56_s12, 8192, %s58_s14, [#allocation9], %s541_s30, %s541_s30, %s542_s6  }
   0xf   :  { %529 = dma.done.wait [#allocation3], 256  }
  0x10   :  { %530 = vsyncadd [#allocation3], 4294967040 }
  0x11   :  { %531 = dma.done.wait [#allocation6], 2112  }
  0x12   :  { %532 = vsyncadd [#allocation6], 4294965184 }
  0x13   :  { %533 = dma.done.wait [#allocation9], 8192  }
  0x14   :  { %534 = vsyncadd [#allocation9], 4294959104  ;;  %v545_v0 = vmov 8.0   ;;  %v122_v2 = vld [vmem:[#allocation5 + $0x70] sm:$0xff]  ;;  %v123_v4 = vld [vmem:[#allocation5 + $0x78] sm:$0xff]  ;;  %vm84_vm0 = vcmask 261120  }
  0x15   :  { %407 = vrcp.f32 %v545_v0  ;;  %v118_v3 = vld [vmem:[#allocation5 + $0x50] sm:$0xff]  ;;  %192 = vmatpush.msra.mxu2 %v122_v2  ;;  %212 = vmatpush.msra.mxu3 %v123_v4  ;;  %v119_v6 = vld [vmem:[#allocation5 + $0x58] sm:$0xff]  ;;  %v120_v14 = vld [vmem:[#allocation5 + $0x60] sm:$0xff]  ;;  %vm136_vm2 = vcmask 1041409   ;;  %s546_s15 = smov [#allocation10]   ;;  %s380_s19 = sshll.u32 %s613_s5, 4  ;;  %s381_s19 = int_to_ptr.hbm [resolvable:$true] %s380_s19 }
  0x16   :  { %v114_v5 = vld [vmem:[#allocation5 + $0x30] sm:$0xff]  ;;  %v115_v8 = vld [vmem:[#allocation5 + $0x38] sm:$0xff]  ;;  %v116_v15 = vld [vmem:[#allocation5 + $0x40] sm:$0xff]  ;;  %152 = vmatpush.msra.mxu0 %v120_v14  ;;  %s378_s16 = sshll.u32 %s546_s15, 4  ;;  %s379_s16 = int_to_ptr.vmem [resolvable:$true] %s378_s16 }
  0x17   :  { %v82_v9 = vld [vmem:[#allocation2] sm:$0xff]  ;;  %v83_v10 = vld [vmem:[#allocation2 + $0x8] sm:$0xff]  ;;  %193 = vmatpush.msra.mxu2 %v118_v3  ;;  %213 = vmatpush.msra.mxu3 %v119_v6  ;;  %v121_v20 = vld [vmem:[#allocation5 + $0x68] sm:$0xff] }
  0x18   :  { %v85_v11 = vsel %vm84_vm0, %v82_v9, 0.0  ;;  %v92_v12 = vsel %vm84_vm0, %v83_v10, 0.0  ;;  %v110_v16 = vld [vmem:[#allocation5 + $0x10] sm:$0xff]  ;;  %v111_v19 = vld [vmem:[#allocation5 + $0x18] sm:$0xff]  ;;  %v112_v22 = vld [vmem:[#allocation5 + $0x20] sm:$0xff]  ;;  %153 = vmatpush.msra.mxu0 %v116_v15  ;;  %172 = vmatpush.msra.mxu1 %v121_v20 }
  0x19   :  { %v86_v17 = vrot.slane %v85_v11, 4  ;;  %v93_v18 = vrot.slane %v92_v12, 4  ;;  %194 = vmatpush.msra.mxu2 %v114_v5  ;;  %214 = vmatpush.msra.mxu3 %v115_v8  ;;  %v117_v23 = vld [vmem:[#allocation5 + $0x48] sm:$0xff]  ;;  %v271_v26 = vld [vmem:[#allocation8 + $0x178] sm:$0xff]  ;;  %v270_v33 = vld [vmem:[#allocation8 + $0x170] sm:$0xff] }
  0x1a   :  { %v108_v27 = vld [vmem:[#allocation5] sm:$0xff]  ;;  %v113_v28 = vld [vmem:[#allocation5 + $0x28] sm:$0xff]  ;;  %154 = vmatpush.msra.mxu0 %v112_v22  ;;  %173 = vmatpush.msra.mxu1 %v117_v23  ;;  %v286_v36 = vld [vmem:[#allocation8 + $0x1f0] sm:$0xff] }
  0x1b   :  { %v589_v1 = vpop.eup %407  ;;  %v87_v24 = vadd.f32 %v86_v17, %v85_v11  ;;  %v94_v25 = vadd.f32 %v93_v18, %v92_v12  ;;  %195 = vmatpush.msra.mxu2 %v110_v16  ;;  %215 = vmatpush.msra.mxu3 %v111_v19  ;;  %v287_v29 = vld [vmem:[#allocation8 + $0x1f8] sm:$0xff]  ;;  %v109_v35 = vld [vmem:[#allocation5 + $0x8] sm:$0xff]  ;;  %v238_v39 = vld [vmem:[#allocation8 + $0x70] sm:$0xff] }
  0x1c   :  { %v100_v7 = vmul.f32 8.0, %v589_v1  ;;  %v239_v32 = vld [vmem:[#allocation8 + $0x78] sm:$0xff]  ;;  %vm104_vm1 = vweird.f32 %v589_v1  ;;  %155 = vmatpush.msra.mxu0 %v108_v27  ;;  %174 = vmatpush.msra.mxu1 %v113_v28  ;;  %v269_v41 = vld [vmem:[#allocation8 + $0x168] sm:$0xff]  ;;  %v254_v46 = vld [vmem:[#allocation8 + $0xf0] sm:$0xff] }
  0x1d   :  { %v88_v30 = vrot.slane %v87_v24, 2  ;;  %v95_v31 = vrot.slane %v94_v25, 2  ;;  %332 = vmatpush.msrb.mxu2 %v271_v26  ;;  %352 = vmatpush.msrb.mxu3 %v287_v29  ;;  %v255_v40 = vld [vmem:[#allocation8 + $0xf8] sm:$0xff]  ;;  %v285_v42 = vld [vmem:[#allocation8 + $0x1e8] sm:$0xff]  ;;  %v268_v48 = vld [vmem:[#allocation8 + $0x160] sm:$0xff] }
  0x1e   :  { %v101_v13 = vsub.f32 1.0, %v100_v7  ;;  %292 = vmatpush.msrb.mxu0 %v239_v32  ;;  %175 = vmatpush.msra.mxu1 %v109_v35  ;;  %v237_v45 = vld [vmem:[#allocation8 + $0x68] sm:$0xff]  ;;  %v284_v49 = vld [vmem:[#allocation8 + $0x1e0] sm:$0xff]  ;;  %v267_v54 = vld [vmem:[#allocation8 + $0x158] sm:$0xff] }
  0x1f   :  { %v89_v37 = vadd.f32 %v88_v30, %v87_v24  ;;  %v96_v38 = vadd.f32 %v95_v31, %v94_v25  ;;  %333 = vmatpush.msrb.mxu2 %v270_v33  ;;  %353 = vmatpush.msrb.mxu3 %v286_v36  ;;  %v236_v52 = vld [vmem:[#allocation8 + $0x60] sm:$0xff]  ;;  %v253_v53 = vld [vmem:[#allocation8 + $0xe8] sm:$0xff]  ;;  %v283_v55 = vld [vmem:[#allocation8 + $0x1d8] sm:$0xff] }
  0x20   :  { %v102_v21 = vmul.f32 %v589_v1, %v101_v13  ;;  %293 = vmatpush.msrb.mxu0 %v238_v39  ;;  %312 = vmatpush.msrb.mxu1 %v255_v40  ;;  %v235_v59 = vld [vmem:[#allocation8 + $0x58] sm:$0xff]  ;;  %v252_v60 = vld [vmem:[#allocation8 + $0xe0] sm:$0xff]  ;;  %v266_v61 = vld [vmem:[#allocation8 + $0x150] sm:$0xff] }
  0x21   :  { %v90_v43 = vrot.slane %v89_v37, 1  ;;  %v97_v44 = vrot.slane %v96_v38, 1  ;;  %334 = vmatpush.msrb.mxu2 %v269_v41  ;;  %354 = vmatpush.msrb.mxu3 %v285_v42  ;;  %v282_v62 = vld [vmem:[#allocation8 + $0x1d0] sm:$0xff]  ;;  %v251_v0 = vld [vmem:[#allocation8 + $0xd8] sm:$0xff]  ;;  %v281_v2 = vld [vmem:[#allocation8 + $0x1c8] sm:$0xff] }
  0x22   :  { %v103_v34 = vadd.f32 %v589_v1, %v102_v21  ;;  %294 = vmatpush.msrb.mxu0 %v237_v45  ;;  %313 = vmatpush.msrb.mxu1 %v254_v46  ;;  %v234_v63 = vld [vmem:[#allocation8 + $0x50] sm:$0xff]  ;;  %v233_v3 = vld [vmem:[#allocation8 + $0x48] sm:$0xff]  ;;  %v264_v5 = vld [vmem:[#allocation8 + $0x140] sm:$0xff] }
  0x23   :  { %v91_v50 = vadd.f32 %v90_v43, %v89_v37  ;;  %v98_v51 = vadd.f32 %v97_v44, %v96_v38  ;;  %335 = vmatpush.msrb.mxu2 %v268_v48  ;;  %355 = vmatpush.msrb.mxu3 %v284_v49  ;;  %v250_v4 = vld [vmem:[#allocation8 + $0xd0] sm:$0xff]  ;;  %v280_v6 = vld [vmem:[#allocation8 + $0x1c0] sm:$0xff]  ;;  %v249_v8 = vld [vmem:[#allocation8 + $0xc8] sm:$0xff] }
  0x24   :  { %v105_v47 = vsel %vm104_vm1, %v589_v1, %v103_v34  ;;  %295 = vmatpush.msrb.mxu0 %v236_v52  ;;  %314 = vmatpush.msrb.mxu1 %v253_v53  ;;  %v265_v1 = vld [vmem:[#allocation8 + $0x148] sm:$0xff]  ;;  %v232_v7 = vld [vmem:[#allocation8 + $0x40] sm:$0xff]  ;;  %v263_v9 = vld [vmem:[#allocation8 + $0x138] sm:$0xff] }
  0x25   :  { %v106_v56 = vmul.f32 %v105_v47, %v91_v50  ;;  %v107_v57 = vmul.f32 %v105_v47, %v98_v51  ;;  %336 = vmatpush.msrb.mxu2 %v267_v54  ;;  %356 = vmatpush.msrb.mxu3 %v283_v55  ;;  %v279_v10 = vld [vmem:[#allocation8 + $0x1b8] sm:$0xff]  ;;  %v248_v12 = vld [vmem:[#allocation8 + $0xc0] sm:$0xff]  ;;  %v262_v13 = vld [vmem:[#allocation8 + $0x130] sm:$0xff] }
  0x26   :  { %296 = vmatpush.msrb.mxu0 %v235_v59  ;;  %315 = vmatpush.msrb.mxu1 %v252_v60  ;;  %v231_v11 = vld [vmem:[#allocation8 + $0x38] sm:$0xff]  ;;  %v278_v14 = vld [vmem:[#allocation8 + $0x1b0] sm:$0xff]  ;;  %v261_v17 = vld [vmem:[#allocation8 + $0x128] sm:$0xff] }
  0x27   :  { %v137_v58 = vsel %vm136_vm2, %v107_v57, %v106_v56  ;;  %337 = vmatpush.msrb.mxu2 %v266_v61  ;;  %357 = vmatpush.msrb.mxu3 %v282_v62  ;;  %v230_v15 = vld [vmem:[#allocation8 + $0x30] sm:$0xff]  ;;  %v247_v16 = vld [vmem:[#allocation8 + $0xb8] sm:$0xff]  ;;  %v277_v18 = vld [vmem:[#allocation8 + $0x1a8] sm:$0xff] }
  0x28   :  { %394 = vmatmul.msk.f32.vlgmr.msra.gmra.mxu2 %vm84_vm0, %v137_v58  ;;  %395 = vmatmul.msk.f32.vlgmr.msra.gmra.mxu3 %vm84_vm0, %v137_v58  ;;  %v229_v19 = vld [vmem:[#allocation8 + $0x28] sm:$0xff]  ;;  %v246_v20 = vld [vmem:[#allocation8 + $0xb0] sm:$0xff]  ;;  %v260_v21 = vld [vmem:[#allocation8 + $0x120] sm:$0xff] }
  0x29   :  { %392 = vmatmul.msk.f32.vlgmr.msra.gmra.mxu0 %vm84_vm0, %v137_v58  ;;  %393 = vmatmul.msk.f32.vlgmr.msra.gmra.mxu1 %vm84_vm0, %v137_v58  ;;  %v276_v22 = vld [vmem:[#allocation8 + $0x1a0] sm:$0xff]  ;;  %v245_v24 = vld [vmem:[#allocation8 + $0xa8] sm:$0xff]  ;;  %v259_v25 = vld [vmem:[#allocation8 + $0x118] sm:$0xff] }
  0x2a   :  { %297 = vmatpush.msrb.mxu0 %v234_v63  ;;  %316 = vmatpush.msrb.mxu1 %v251_v0  ;;  %v228_v23 = vld [vmem:[#allocation8 + $0x20] sm:$0xff]  ;;  %v227_v26 = vld [vmem:[#allocation8 + $0x18] sm:$0xff]  ;;  %v258_v28 = vld [vmem:[#allocation8 + $0x110] sm:$0xff] }
  0x2b   :  { %338 = vmatpush.msrb.mxu2 %v265_v1  ;;  %358 = vmatpush.msrb.mxu3 %v281_v2  ;;  %v244_v27 = vld [vmem:[#allocation8 + $0xa0] sm:$0xff]  ;;  %v275_v29 = vld [vmem:[#allocation8 + $0x198] sm:$0xff]  ;;  %v226_v30 = vld [vmem:[#allocation8 + $0x10] sm:$0xff] }
  0x2c   :  { %298 = vmatpush.msrb.mxu0 %v233_v3  ;;  %317 = vmatpush.msrb.mxu1 %v250_v4  ;;  %v243_v31 = vld [vmem:[#allocation8 + $0x98] sm:$0xff]  ;;  %v257_v32 = vld [vmem:[#allocation8 + $0x108] sm:$0xff]  ;;  %v274_v33 = vld [vmem:[#allocation8 + $0x190] sm:$0xff] }
  0x2d   :  { %339 = vmatpush.msrb.mxu2 %v264_v5  ;;  %359 = vmatpush.msrb.mxu3 %v280_v6  ;;  %v225_v34 = vld [vmem:[#allocation8 + $0x8] sm:$0xff]  ;;  %v242_v35 = vld [vmem:[#allocation8 + $0x90] sm:$0xff]  ;;  %v256_v36 = vld [vmem:[#allocation8 + $0x100] sm:$0xff] }
  0x2e   :  { %299 = vmatpush.msrb.mxu0 %v232_v7  ;;  %318 = vmatpush.msrb.mxu1 %v249_v8  ;;  %v273_v37 = vld [vmem:[#allocation8 + $0x188] sm:$0xff]  ;;  %v224_v38 = vld [vmem:[#allocation8] sm:$0xff]  ;;  %v124_v42 = vld [vmem:[#allocation7] sm:$0xf] }
  0x2f   :  { %340 = vmatpush.msrb.mxu2 %v263_v9  ;;  %360 = vmatpush.msrb.mxu3 %v279_v10  ;;  %v241_v39 = vld [vmem:[#allocation8 + $0x88] sm:$0xff]  ;;  %v272_v40 = vld [vmem:[#allocation8 + $0x180] sm:$0xff]  ;;  %v126_v43 = vperm.slane %v124_v42, 0  ;;  %v127_v44 = vperm.slane %v124_v42, 1  ;;  %v128_v49 = vperm.slane %v124_v42, 2  ;;  %v129_v50 = vperm.slane %v124_v42, 3 }
  0x30   :  { %300 = vmatpush.msrb.mxu0 %v231_v11  ;;  %319 = vmatpush.msrb.mxu1 %v248_v12  ;;  %v240_v41 = vld [vmem:[#allocation8 + $0x80] sm:$0xff]  ;;  %v406_v59 = vld [vmem:[%s612_s4] ss:$0 sm:$0xff] }
  0x31   :  { %341 = vmatpush.msrb.mxu2 %v262_v13  ;;  %361 = vmatpush.msrb.mxu3 %v278_v14 }
  0x32   :  { %301 = vmatpush.msrb.mxu0 %v230_v15  ;;  %320 = vmatpush.msrb.mxu1 %v247_v16 }
  0x33   :  { %342 = vmatpush.msrb.mxu2 %v261_v17  ;;  %362 = vmatpush.msrb.mxu3 %v277_v18 }
  0x34   :  { %302 = vmatpush.msrb.mxu0 %v229_v19  ;;  %321 = vmatpush.msrb.mxu1 %v246_v20 }
  0x35   :  { %343 = vmatpush.msrb.mxu2 %v260_v21  ;;  %363 = vmatpush.msrb.mxu3 %v276_v22 }
  0x36   :  { %303 = vmatpush.msrb.mxu0 %v228_v23  ;;  %322 = vmatpush.msrb.mxu1 %v245_v24 }
  0x37   :  { %344 = vmatpush.msrb.mxu2 %v259_v25  ;;  %364 = vmatpush.msrb.mxu3 %v275_v29 }
  0x38   :  { %304 = vmatpush.msrb.mxu0 %v227_v26  ;;  %323 = vmatpush.msrb.mxu1 %v244_v27 }
  0x39   :  { %345 = vmatpush.msrb.mxu2 %v258_v28  ;;  %365 = vmatpush.msrb.mxu3 %v274_v33 }
  0x3a   :  { %305 = vmatpush.msrb.mxu0 %v226_v30  ;;  %324 = vmatpush.msrb.mxu1 %v243_v31 }
  0x3b   :  { %346 = vmatpush.msrb.mxu2 %v257_v32  ;;  %366 = vmatpush.msrb.mxu3 %v273_v37 }
  0x3c   :  { %306 = vmatpush.msrb.mxu0 %v225_v34  ;;  %325 = vmatpush.msrb.mxu1 %v242_v35 }
  0x3d   :  { %347 = vmatpush.msrb.mxu2 %v256_v36  ;;  %367 = vmatpush.msrb.mxu3 %v272_v40 }
  0x3e   :  { %307 = vmatpush.msrb.mxu0 %v224_v38  ;;  %326 = vmatpush.msrb.mxu1 %v241_v39 }
  0x40   :  { %327 = vmatpush.msrb.mxu1 %v240_v41 }
  0xa6   :  { %v157_v45 = vpop.f32.mrf.mxu0  ;;  %v177_v46 = vpop.f32.mrf.mxu1 }
  0xa7   :  { %v158_v47 = vadd.f32 %v157_v45, %v126_v43  ;;  %v178_v48 = vadd.f32 %v177_v46, %v127_v44 }
  0xa9   :  { %v220_v51 = vmax.f32 %v158_v47, 0.0  ;;  %v221_v52 = vmax.f32 %v178_v48, 0.0 }
  0xab   :  { %v197_v53 = vpop.f32.mrf.mxu2  ;;  %v217_v54 = vpop.f32.mrf.mxu3  ;;  %308 = vmatmul.f32.vlgmr.msrb.gmra.mxu0 %v220_v51  ;;  %328 = vmatmul.f32.vlgmr.msrb.gmra.mxu1 %v221_v52 }
  0xac   :  { %v198_v55 = vadd.f32 %v197_v53, %v128_v49  ;;  %v218_v56 = vadd.f32 %v217_v54, %v129_v50 }
  0xae   :  { %v222_v57 = vmax.f32 %v198_v55, 0.0  ;;  %v223_v58 = vmax.f32 %v218_v56, 0.0 }
  0xb0   :  { %348 = vmatmul.f32.vlgmr.msrb.gmra.mxu2 %v222_v57  ;;  %368 = vmatmul.f32.vlgmr.msrb.gmra.mxu3 %v223_v58 }
 0x128   :  { %v309_v60 = vpop.f32.mrf.mxu0  ;;  %v329_v62 = vpop.f32.mrf.mxu1 }
 0x129   :  { %v310_v61 = vadd.f32 %v406_v59, %v309_v60 }
 0x12b   :  { %v330_v63 = vadd.f32 %v329_v62, %v310_v61 }
 0x133   :  { %v349_v0 = vpop.f32.mrf.mxu2  ;;  %v369_v1 = vpop.f32.mrf.mxu3 }
 0x134   :  { %v350_v2 = vadd.f32 %v349_v0, %v330_v63 }
 0x136   :  { %v370_v3 = vadd.f32 %v369_v1, %v350_v2 }
 0x138   :  { %372 = vst [vmem:[#allocation10] sm:$0x3] %v370_v3 }
 0x139   :  { %383 = dma.vmem_to_hbm [thread:$0]  %s379_s16, 32, %s381_s19, [#allocation4]  }
 0x13a   :  { %535 = dma.done.wait [#allocation4], 32  }
 0x13b   :  { %536 = vsyncadd [#allocation4], 4294967264 }
 0x13c   :  { %388 = vsyncpa [#allocation3], 1 }
 0x13d   :  { %389 = vsyncpa [#allocation6], 1 }
 0x13e   :  { %390 = vsyncpa [#allocation9], 1 }
 0x13f   :  { %391 = vsyncpa [#allocation4], 1 }

</bundles_post_ra>
